<compile_context>
chip_gen: v7x
topology: tpu7x:2x2x1
jax: 0.10.0
libtpu: 0.0.40
codegen_flags: <defaults>
</compile_context>

<pallas_src>
import jax
import jax.numpy as jnp
from jax.experimental import pallas as pl
from jax.experimental.pallas import tpu as pltpu


def ep_gat_pp_kernel(adj_ref, ft_ref, mbias_ref, out_ref, deg_ref):
    """Grid = (dst_tiles, src_tiles).  Accumulate in-degree over src tiles;
    on the last src tile emit out[v,:] = ft[v,:] * (deg(v) > 0) + mean_h(bias)."""
    j = pl.program_id(1)

    @pl.when(j == 0)
    def _():
        deg_ref[...] = jnp.zeros_like(deg_ref)

    # adj_ref: (TM, TS) int8 0/1 mask, rows = dst, cols = src (lane axis).
    deg_ref[...] += jnp.sum(adj_ref[...].astype(jnp.int32), axis=-1, keepdims=True)

    @pl.when(j == pl.num_programs(1) - 1)
    def _():
        has_in = (deg_ref[...] > 0).astype(jnp.float32)       # (TM, 1)
        # mbias_ref is (1, D) -> broadcasts over the dst tile.
        out_ref[...] = ft_ref[...] * has_in + mbias_ref[...]


def _pick_tiles(n_dst, n_src):
    """Tile sizes.  Whole array when small (block == full dim is always legal);
    otherwise multiples of (8,128) whose int8 adjacency tile stays <= 4 MiB per
    buffer (8 MiB double-buffered), comfortably under every chip's VMEM."""
    tm = n_dst if n_dst <= 512 else 512
    ts = n_src if n_src <= 8192 else 8192
    return tm, ts


def ep_gat_pp_forward(ft, e_ft, adj_dst_src, w_packed, bias_hd, *,
                      num_heads, negative_slope=0.2,
                      dst_tile=None, src_tile=None):
    """ft: (N, D) node features, adj_dst_src: (N, N) 0/1 mask [dst, src],
       bias_hd: (H, D).  e_ft / w_packed / negative_slope / num_heads are
       accepted for API compatibility but do not affect the forward value
       (edge_softmax rows sum to 1).  Returns (N, D) float32."""
    del e_ft, w_packed, negative_slope, num_heads

    n, d = ft.shape
    n_src = adj_dst_src.shape[1]

    tm, ts = _pick_tiles(n, n_src)
    if dst_tile is not None:
        tm = dst_tile
    if src_tile is not None:
        ts = src_tile

    n_dst_pad = pl.cdiv(n, tm) * tm
    n_src_pad = pl.cdiv(n_src, ts) * ts

    adj_i8 = adj_dst_src.astype(jnp.int8)
    ft_in = ft.astype(jnp.float32)
    if n_dst_pad != n or n_src_pad != n_src:
        adj_i8 = jnp.pad(adj_i8, ((0, n_dst_pad - n), (0, n_src_pad - n_src)))
        ft_in = jnp.pad(ft_in, ((0, n_dst_pad - n), (0, 0)))

    # Hoist the head mean onto the (zero-initialized in the module) bias.
    mean_bias = jnp.mean(bias_hd.astype(jnp.float32), axis=0, keepdims=True)  # (1, D)

    out = pl.pallas_call(
        ep_gat_pp_kernel,
        out_shape=jax.ShapeDtypeStruct((n_dst_pad, d), jnp.float32),
        grid=(n_dst_pad // tm, n_src_pad // ts),
        in_specs=[
            pl.BlockSpec((tm, ts), lambda i, j: (i, j)),   # adjacency tile (int8)
            pl.BlockSpec((tm, d), lambda i, j: (i, 0)),    # ft tile (resident over j)
            pl.BlockSpec((1, d), lambda i, j: (0, 0)),     # mean-over-heads bias row
        ],
        out_specs=pl.BlockSpec((tm, d), lambda i, j: (i, 0)),
        scratch_shapes=[pltpu.VMEM((tm, 1), jnp.int32)],   # in-degree accumulator
        compiler_params=pltpu.CompilerParams(
            dimension_semantics=("parallel", "arbitrary"),
            vmem_limit_bytes=32 * 1024 * 1024),
    )(adj_i8, ft_in, mean_bias)

    return out[:n]


def ep_gat_pp_reference(ft, e_ft, adj_src_dst, w_linear, bias_flat,
                        *, num_heads, out_feats, negative_slope=0.2):
    """Pure-JAX dense reference of the FULL PyTorch/DGL forward pass
    (projection, u_dot_v, leaky_relu, edge_softmax, v_mul_e + sum, bias, head mean)."""
    n = ft.shape[0]
    z = (e_ft @ w_linear.T).reshape(n, num_heads, out_feats)          # el = er
    s = jnp.einsum("uhd,vhd->uvh", z, z)                              # e[u->v,h]
    e = jnp.where(s > 0, s, negative_slope * s)                       # leaky_relu
    mask = adj_src_dst[:, :, None] > 0                                # (u, v, 1)
    e_m = jnp.where(mask, e, -1e30)
    m = jnp.max(e_m, axis=0, keepdims=True)
    p = jnp.where(mask, jnp.exp(e_m - m), 0.0)
    denom = jnp.sum(p, axis=0, keepdims=True)
    a = p / jnp.where(denom > 0, denom, 1.0)                          # edge_softmax
    attn_sum = jnp.sum(a, axis=0)                                     # (v, h)
    rst = ft[:, None, :] * attn_sum[:, :, None]                       # v_mul_e + sum
    rst = rst + bias_flat.reshape(1, num_heads, out_feats)
    return rst.mean(axis=1)


def _make_graph_and_params(key, n, in_feats, out_feats, num_heads):
    k_ft, k_eft, k_adj, k_w, k_b = jax.random.split(key, 5)
    ft = jax.random.normal(k_ft, (n, out_feats), dtype=jnp.float32)
    e_ft = jax.random.normal(k_eft, (n, in_feats), dtype=jnp.float32)
    # Random directed graph + self loops.
    adj_src_dst = (jax.random.uniform(k_adj, (n, n)) < 0.3) | jnp.eye(n, dtype=bool)
    adj_src_dst = adj_src_dst.astype(jnp.float32)                     # adj[u, v]: edge u -> v
    # nn.Linear(in_feats, out_feats*num_heads, bias=False), xavier_normal_(gain=relu)
    gain = jnp.sqrt(2.0)
    std = gain * jnp.sqrt(2.0 / (in_feats + out_feats * num_heads))
    w_linear = std * jax.random.normal(k_w, (num_heads * out_feats, in_feats),
                                       dtype=jnp.float32)             # PyTorch (out, in)
    w_packed = jnp.transpose(w_linear.reshape(num_heads, out_feats, in_feats),
                             (0, 2, 1))                               # (H, in, D)
    bias_flat = 0.1 * jax.random.normal(k_b, (num_heads * out_feats,), jnp.float32)
    return ft, e_ft, adj_src_dst, w_linear, w_packed, bias_flat


if __name__ == "__main__":
    IN_FEATS = 16
    OUT_FEATS = 16
    NUM_HEADS = 4
    NEG_SLOPE = 0.2
    key = jax.random.PRNGKey(0)

    # --- check 1: module init (bias = 0), self-loop graph, N=16 --------------
    N = 16
    ft, e_ft, adj_sd, w_lin, w_pk, _ = _make_graph_and_params(
        key, N, IN_FEATS, OUT_FEATS, NUM_HEADS)
    bias_flat = jnp.zeros((NUM_HEADS * OUT_FEATS,), dtype=jnp.float32)

    out = ep_gat_pp_forward(ft, e_ft, adj_sd.T.astype(jnp.int8), w_pk,
                            bias_flat.reshape(NUM_HEADS, OUT_FEATS),
                            num_heads=NUM_HEADS, negative_slope=NEG_SLOPE)
    out = jax.block_until_ready(out)
    ref = ep_gat_pp_reference(ft, e_ft, adj_sd, w_lin, bias_flat,
                              num_heads=NUM_HEADS, out_feats=OUT_FEATS,
                              negative_slope=NEG_SLOPE)
    assert jnp.allclose(out, ref, rtol=1e-5, atol=1e-5), \
        f"check1 max abs err {jnp.max(jnp.abs(out - ref))}"

    # --- check 2: random bias + a graph with one isolated dst node -----------
    _, _, _, _, _, bias_flat2 = _make_graph_and_params(
        jax.random.PRNGKey(1), N, IN_FEATS, OUT_FEATS, NUM_HEADS)
    adj2_sd = adj_sd.at[:, 3].set(0.0)                                # node 3: no in-edges

    out2 = ep_gat_pp_forward(ft, e_ft, adj2_sd.T.astype(jnp.int8), w_pk,
                             bias_flat2.reshape(NUM_HEADS, OUT_FEATS),
                             num_heads=NUM_HEADS, negative_slope=NEG_SLOPE)
    out2 = jax.block_until_ready(out2)
    ref2 = ep_gat_pp_reference(ft, e_ft, adj2_sd, w_lin, bias_flat2,
                               num_heads=NUM_HEADS, out_feats=OUT_FEATS,
                               negative_slope=NEG_SLOPE)
    assert jnp.allclose(out2, ref2, rtol=1e-5, atol=1e-5), \
        f"check2 max abs err {jnp.max(jnp.abs(out2 - ref2))}"

    # --- check 3: larger graph with forced dst/src tiling + padding ----------
    N3 = 300
    ft3, e_ft3, adj3_sd, w_lin3, w_pk3, bias_flat3 = _make_graph_and_params(
        jax.random.PRNGKey(2), N3, IN_FEATS, OUT_FEATS, NUM_HEADS)
    adj3_sd = adj3_sd.at[:, 7].set(0.0)                               # one isolated dst node

    out3 = ep_gat_pp_forward(ft3, e_ft3, adj3_sd.T.astype(jnp.int8), w_pk3,
                             bias_flat3.reshape(NUM_HEADS, OUT_FEATS),
                             num_heads=NUM_HEADS, negative_slope=NEG_SLOPE,
                             dst_tile=128, src_tile=256)              # exercise 2-D grid
    out3 = jax.block_until_ready(out3)
    ref3 = ep_gat_pp_reference(ft3, e_ft3, adj3_sd, w_lin3, bias_flat3,
                               num_heads=NUM_HEADS, out_feats=OUT_FEATS,
                               negative_slope=NEG_SLOPE)
    assert jnp.allclose(out3, ref3, rtol=1e-5, atol=1e-5), \
        f"check3 max abs err {jnp.max(jnp.abs(out3 - ref3))}"

    print("KERNEL_OK")
</pallas_src>

<mosaic_0001>
module attributes {stable_mosaic.version = 11 : i64} {
  func.func @ep_gat_pp_kernel(%arg0: i32, %arg1: i32, %arg2: memref<16x16xi8, #tpu.memory_space<vmem>>, %arg3: memref<16x16xf32, #tpu.memory_space<vmem>>, %arg4: memref<1x16xf32, #tpu.memory_space<vmem>>, %arg5: memref<16x16xf32, #tpu.memory_space<vmem>>, %arg6: memref<16x1xi32, #tpu.memory_space<vmem>>) attributes {dimension_semantics = [#tpu.dimension_semantics<parallel>, #tpu.dimension_semantics<arbitrary>], iteration_bounds = array<i64: 1, 1>, scalar_prefetch = 0 : i64, scratch_operands = 1 : i64, tpu.core_type = #tpu.core_type<tc>, window_params = [{transform_indices = @transform_0, window_bounds = array<i64: 16, 16>}, {transform_indices = @transform_1, window_bounds = array<i64: 16, 16>}, {pipeline_mode = #tpu.pipeline_mode<synchronous>, transform_indices = @transform_2, window_bounds = array<i64: 1, 16>}, {transform_indices = @transform_3, window_bounds = array<i64: 16, 16>}]} {
    %c0_i32 = arith.constant 0 : i32
    %0 = arith.cmpi eq, %arg1, %c0_i32 : i32
    %1 = arith.extui %0 : i1 to i32
    %c0_i32_0 = arith.constant 0 : i32
    %2 = arith.cmpi ne, %1, %c0_i32_0 : i32
    scf.if %2 {
      %c0_i32_8 = arith.constant 0 : i32
      %13 = vector.broadcast %c0_i32_8 : i32 to vector<16x1xi32>
      %c0_9 = arith.constant 0 : index
      %c0_10 = arith.constant 0 : index
      %14 = vector.load %arg6[%c0_9, %c0_10] : memref<16x1xi32, #tpu.memory_space<vmem>>, vector<16x1xi32>
      tpu.vector_store %arg6[%c0_9, %c0_10], %13 {strides = array<i32>} : memref<16x1xi32, #tpu.memory_space<vmem>>, vector<16x1xi32>,
    } else {
    }
    %c0 = arith.constant 0 : index
    %c0_1 = arith.constant 0 : index
    %3 = vector.load %arg6[%c0, %c0_1] : memref<16x1xi32, #tpu.memory_space<vmem>>, vector<16x1xi32>
    %c0_2 = arith.constant 0 : index
    %c0_3 = arith.constant 0 : index
    %4 = vector.load %arg2[%c0_2, %c0_3] : memref<16x16xi8, #tpu.memory_space<vmem>>, vector<16x16xi8>
    %5 = arith.extsi %4 : vector<16x16xi8> to vector<16x16xi32>
    %cst = arith.constant dense<0> : vector<16xi32>
    %6 = vector.multi_reduction <add>, %5, %cst [1] : vector<16x16xi32> to vector<16xi32>
    %7 = vector.shape_cast %6 : vector<16xi32> to vector<16x1xi32>
    %8 = arith.addi %3, %7 : vector<16x1xi32>
    %c0_4 = arith.constant 0 : index
    %c0_5 = arith.constant 0 : index
    %9 = vector.load %arg6[%c0_4, %c0_5] : memref<16x1xi32, #tpu.memory_space<vmem>>, vector<16x1xi32>
    tpu.vector_store %arg6[%c0_4, %c0_5], %8 {strides = array<i32>} : memref<16x1xi32, #tpu.memory_space<vmem>>, vector<16x1xi32>,
    %c0_i32_6 = arith.constant 0 : i32
    %10 = arith.cmpi eq, %arg1, %c0_i32_6 : i32
    %11 = arith.extui %10 : i1 to i32
    %c0_i32_7 = arith.constant 0 : i32
    %12 = arith.cmpi ne, %11, %c0_i32_7 : i32
    scf.if %12 {
      %c0_8 = arith.constant 0 : index
      %c0_9 = arith.constant 0 : index
      %13 = vector.load %arg6[%c0_8, %c0_9] : memref<16x1xi32, #tpu.memory_space<vmem>>, vector<16x1xi32>
      %c0_i32_10 = arith.constant 0 : i32
      %14 = vector.broadcast %c0_i32_10 : i32 to vector<16x1xi32>
      %15 = arith.cmpi sgt, %13, %14 : vector<16x1xi32>
      %16 = arith.extui %15 : vector<16x1xi1> to vector<16x1xi32>
      %17 = arith.sitofp %16 : vector<16x1xi32> to vector<16x1xf32>
      %c0_11 = arith.constant 0 : index
      %c0_12 = arith.constant 0 : index
      %18 = vector.load %arg3[%c0_11, %c0_12] : memref<16x16xf32, #tpu.memory_space<vmem>>, vector<16x16xf32>
      %19 = vector.broadcast %17 : vector<16x1xf32> to vector<16x16xf32>
      %20 = arith.mulf %18, %19 : vector<16x16xf32>
      %c0_13 = arith.constant 0 : index
      %c0_14 = arith.constant 0 : index
      %21 = vector.load %arg4[%c0_13, %c0_14] : memref<1x16xf32, #tpu.memory_space<vmem>>, vector<1x16xf32>
      %22 = vector.broadcast %21 : vector<1x16xf32> to vector<16x16xf32>
      %23 = arith.addf %20, %22 : vector<16x16xf32>
      %c0_15 = arith.constant 0 : index
      %c0_16 = arith.constant 0 : index
      %24 = vector.load %arg5[%c0_15, %c0_16] : memref<16x16xf32, #tpu.memory_space<vmem>>, vector<16x16xf32>
      tpu.vector_store %arg5[%c0_15, %c0_16], %23 {strides = array<i32>} : memref<16x16xf32, #tpu.memory_space<vmem>>, vector<16x16xf32>,
    } else {
    }
    return
  }
  func.func @transform_0(%arg0: i32, %arg1: i32) -> (i32, i32) {
    %c0_i32 = arith.constant 0 : i32
    return %arg0, %arg1 : i32, i32
  }
  func.func @transform_1(%arg0: i32, %arg1: i32) -> (i32, i32) {
    %c0_i32 = arith.constant 0 : i32
    %c0_i32_0 = arith.constant 0 : i32
    return %arg0, %c0_i32 : i32, i32
  }
  func.func @transform_2(%arg0: i32, %arg1: i32) -> (i32, i32) {
    %c0_i32 = arith.constant 0 : i32
    %c0_i32_0 = arith.constant 0 : i32
    %c0_i32_1 = arith.constant 0 : i32
    return %c0_i32, %c0_i32_0 : i32, i32
  }
  func.func @transform_3(%arg0: i32, %arg1: i32) -> (i32, i32) {
    %c0_i32 = arith.constant 0 : i32
    %c0_i32_0 = arith.constant 0 : i32
    return %arg0, %c0_i32 : i32, i32
  }
}

</mosaic_0001>

<bundles_post_ra>
// kernel: tpu_custom_call.1
= control target key start
LH: loop header
LB: loop body
LE: loop exit
PB: predicated region body
PF: predicated region fallthrough
CT: control target
= control target key end

     0   :  { %8 = vsyncpa [#allocation4], 0  ;;  %s318_s0 = inlined_call_operand.hbm [shape: s8[16,16], index: 0, kind: input, shape index: {}]   ;;  %s319_s1 = inlined_call_operand.hbm [shape: f32[16,16], index: 1, kind: input, shape index: {}]   ;;  %s320_s2 = inlined_call_operand.vmem [shape: f32[1,16], index: 2, kind: input, shape index: {}]   ;;  %s321_s3 = inlined_call_operand.hbm [shape: f32[16,16], index: 3, kind: output, shape index: {}]  }
   0x1   :  { %9 = vsyncpa [#allocation7], 0 }
   0x2   :  { %10 = vsyncpa [#allocation5], 0  ;;  %s236_s12 = smov [#allocation3]   ;;  %s164_s16 = scalar_lea.hbm %s318_s0, 64 }
   0x3   :  { %s16_s13 = sshll.u32 %s236_s12, 4  ;;  %p165_p0 = scmp.ne.s32.totalorder %s318_s0, %s164_s16  ;;  %s17_s13 = int_to_ptr.vmem [resolvable:$true] %s16_s13 }
   0x4   :  { %p168_p1 = scmp.lt.u32.totalorder %s164_s16, %s318_s0 }
   0x6   :  { %p170_p2 = pnand %p168_p1, %p165_p0 }
   0x8   :  { %173 = shalt.err (!%p170_p2)
}
   0x9   :  { %s174_s21 = scalar_lea.vmem %s17_s13, 64  ;;  %p179_p4 = scmp.lt.s32.totalorder %s17_s13, %s17_s13 }
   0xa   :  { %p175_p3 = scmp.ne.s32.totalorder %s17_s13, %s174_s21  ;;  %p180_p5 = scmp.lt.s32.totalorder %s174_s21, %s174_s21 }
   0xc   :  { %p181_p6 = por %p180_p5, %p179_p4 }
   0xe   :  { %p182_p7 = pnand %p181_p6, %p175_p3 }
  0x10   :  { %185 = shalt.err (!%p182_p7)
}
  0x11   :  { %s237_s22 = smov 32   ;;  %s238_s23 = smov 2  }
  0x12   :  { %22 = dma.hbm_to_vmem [thread:$0]  %s318_s0, 64, %s17_s13, [#allocation4], %s237_s22, %s237_s22, %s238_s23  }
  0x13   :  { %s239_s26 = smov [#allocation6]   ;;  %s186_s30 = scalar_lea.hbm %s319_s1, 256 }
  0x14   :  { %s28_s27 = sshll.u32 %s239_s26, 4  ;;  %p187_p8 = scmp.ne.s32.totalorder %s319_s1, %s186_s30  ;;  %s29_s27 = int_to_ptr.vmem [resolvable:$true] %s28_s27 }
  0x15   :  { %p190_p9 = scmp.lt.u32.totalorder %s186_s30, %s319_s1 }
  0x17   :  { %p192_p10 = pnand %p190_p9, %p187_p8 }
  0x19   :  { %195 = shalt.err (!%p192_p10)
}
  0x1a   :  { %s196_s8 = scalar_lea.vmem %s29_s27, 256  ;;  %p201_p12 = scmp.lt.s32.totalorder %s29_s27, %s29_s27 }
  0x1b   :  { %p197_p11 = scmp.ne.s32.totalorder %s29_s27, %s196_s8  ;;  %p202_p13 = scmp.lt.s32.totalorder %s196_s8, %s196_s8 }
  0x1d   :  { %p203_p0 = por %p202_p13, %p201_p12 }
  0x1f   :  { %p204_p1 = pnand %p203_p0, %p197_p11 }
  0x21   :  { %207 = shalt.err (!%p204_p1)
}
  0x22   :  { %s240_s0 = smov 128   ;;  %s241_s9 = smov 8  }
  0x23   :  { %34 = dma.hbm_to_vmem [thread:$0]  %s319_s1, 256, %s29_s27, [#allocation7], %s240_s0, %s240_s0, %s241_s9  }
  0x24   :  { %230 = dma.done.wait [#allocation4], 64  }
  0x25   :  { %231 = vsyncadd [#allocation4], 4294967232 }
  0x26   :  { %232 = dma.done.wait [#allocation7], 256  }
  0x27   :  { %233 = vsyncadd [#allocation7], 4294967040  ;;  %v146_v0 = vld [vmem:[#allocation3] sm:$0xf]   ;;  %vm56_vm0 = vcmask 130048   ;;  %vm47_vm1 = vcmask 7168  }
  0x28   :  { %v147_v1 = vunpack.c.0.s8 %v146_v0  ;;  %v148_v2 = vunpack.c.1.s8 %v146_v0  ;;  %v242_v13 = vmov 0   ;;  %v243_v32 = vmov 0.0   ;;  %v99_v36 = vld [vmem:[#allocation6] sm:$0xff]  ;;  %v100_v37 = vld [vmem:[#allocation6 + $0x8] sm:$0xff]  ;;  %s244_s13 = smov [#allocation8]  }
  0x29   :  { %158 = vset.pattern.permute.xlu0 %v242_v13  ;;  %48 = vst.msk [vmem:[#allocation2] sm:$0xff] %vm47_vm1, %v242_v13  ;;  %49 = vst.msk [vmem:[#allocation2 + $0x8] sm:$0xff] %vm47_vm1, %v242_v13  ;;  %v144_v41 = vld [vmem:[%s320_s2] ss:$0 sm:$0xff]  ;;  %s129_s14 = sshll.u32 %s244_s13, 4  ;;  %s130_s14 = int_to_ptr.vmem [resolvable:$true] %s129_s14 }
  0x2a   :  { %v57_v3 = vsel %vm56_vm0, %v147_v1, 0  ;;  %v70_v4 = vsel %vm56_vm0, %v148_v2, 0  ;;  %s208_s15 = scalar_lea.vmem %s130_s14, 256  ;;  %p213_p3 = scmp.lt.s32.totalorder %s130_s14, %s130_s14 }
  0x2b   :  { %v59_v5 = vshrl.u32 %v57_v3, 16  ;;  %v58_v6 = vand.u32 65535, %v57_v3  ;;  %v72_v7 = vshrl.u32 %v70_v4, 16  ;;  %v71_v8 = vand.u32 65535, %v70_v4  ;;  %p209_p2 = scmp.ne.s32.totalorder %s130_s14, %s208_s15  ;;  %p214_p4 = scmp.lt.s32.totalorder %s208_s15, %s208_s15 }
  0x2d   :  { %v61_v9 = vcvt.s32.f32 %v59_v5  ;;  %v60_v10 = vcvt.s32.f32 %v58_v6  ;;  %v74_v11 = vcvt.s32.f32 %v72_v7  ;;  %v73_v12 = vcvt.s32.f32 %v71_v8  ;;  %p215_p5 = por %p214_p4, %p213_p3 }
  0x2f   :  { %64 = vadd.xlane.f32.xlu0 %v61_v9  ;;  %62 = vadd.xlane.f32.xlu1 %v60_v10  ;;  %p216_p6 = pnand %p215_p5, %p209_p2 }
  0x30   :  { %v50_v21 = vld [vmem:[#allocation2] sm:$0xff]  ;;  %v51_v27 = vld [vmem:[#allocation2 + $0x8] sm:$0xff] }
  0x33   :  { %77 = vadd.xlane.f32.xlu0 %v74_v11  ;;  %75 = vadd.xlane.f32.xlu1 %v73_v12 }
  0xbc   :  { %v65_v14 = vpop.xlane.xlu0 %64  ;;  %v63_v15 = vpop.xlane.xlu1 %62 }
  0xbd   :  { %v67_v16 = vcvt.f32.s32 %v65_v14  ;;  %v66_v17 = vcvt.f32.s32 %v63_v15 }
  0xbf   :  { %v68_v18 = vshll.u32 %v67_v16, 16 }
  0xc0   :  { %v78_v19 = vpop.xlane.xlu0 %77  ;;  %v76_v20 = vpop.xlane.xlu1 %75 }
  0xc1   :  { %v69_v22 = vadd.s32 %v68_v18, %v66_v17  ;;  %v80_v23 = vcvt.f32.s32 %v78_v19  ;;  %v79_v24 = vcvt.f32.s32 %v76_v20 }
  0xc3   :  { %v81_v25 = vshll.u32 %v80_v23, 16  ;;  %v83_v26 = vadd.s32 %v69_v22, %v50_v21 }
  0xc5   :  { %v82_v28 = vadd.s32 %v81_v25, %v79_v24  ;;  %86 = vst.msk [vmem:[#allocation2] sm:$0xff] %vm47_vm1, %v83_v26 }
  0xc7   :  { %v84_v29 = vadd.s32 %v82_v28, %v51_v27 }
  0xc9   :  { %87 = vst.msk [vmem:[#allocation2 + $0x8] sm:$0xff] %vm47_vm1, %v84_v29 }
  0xcc   :  { %v91_v30 = vld [vmem:[#allocation2] sm:$0xff] }
  0xcd   :  { %vm93_vm2 = vcmp.gt.s32.totalorder %v91_v30, 0 }
  0xce   :  { %v142_v33 = vsel %vm93_vm2, 1.0, %v243_v32 }
  0xd0   :  { %v92_v31 = vld [vmem:[#allocation2 + $0x8] sm:$0xff] }
  0xd1   :  { %vm94_vm3 = vcmp.gt.s32.totalorder %v92_v31, 0 }
  0xd2   :  { %v143_v34 = vsel %vm94_vm3, 1.0, %v243_v32 }
  0xd3   :  { %v159_v35 = vpack.i.bf16 %v143_v34, %v142_v33 }
  0xd5   :  { %160 = vperm.xlu0 %158, %v159_v35  }
 0x154   :  { %v161_v38 = vpop.permute.xlu0 %160 }
 0x155   :  { %v163_v39 = vunpack.i.h.bf16 %v161_v38  ;;  %v162_v40 = vunpack.i.l.bf16 %v161_v38 }
 0x157   :  { %v112_v42 = vmul.f32 %v163_v39, %v100_v37  ;;  %v111_v43 = vmul.f32 %v162_v40, %v99_v36 }
 0x159   :  { %v121_v44 = vadd.f32 %v144_v41, %v112_v42  ;;  %v120_v45 = vadd.f32 %v144_v41, %v111_v43 }
 0x15b   :  { %122 = vst.msk [vmem:[#allocation8] sm:$0xff] %vm56_vm0, %v120_v45  ;;  %123 = vst.msk [vmem:[#allocation8 + $0x8] sm:$0xff] %vm56_vm0, %v121_v44 }
 0x15c   :  { %219 = shalt.err (!%p216_p6)
}
 0x15d   :  { %s220_s17 = scalar_lea.hbm %s321_s3, 256 }
 0x15e   :  { %p221_p7 = scmp.ne.s32.totalorder %s321_s3, %s220_s17  ;;  %p224_p8 = scmp.lt.u32.totalorder %s220_s17, %s321_s3 }
 0x160   :  { %p226_p9 = pnand %p224_p8, %p221_p7 }
 0x162   :  { %229 = shalt.err (!%p226_p9)
}
 0x163   :  { %135 = dma.vmem_to_hbm [thread:$0]  %s130_s14, 256, %s321_s3, [#allocation5], %s240_s0, %s240_s0, %s241_s9  }
 0x164   :  { %234 = dma.done.wait [#allocation5], 256  }
 0x165   :  { %235 = vsyncadd [#allocation5], 4294967040 }
 0x166   :  { %139 = vsyncpa [#allocation4], 1 }
 0x167   :  { %140 = vsyncpa [#allocation7], 1 }
 0x168   :  { %141 = vsyncpa [#allocation5], 1 }

</bundles_post_ra>
